<compile_context>
chip_gen: v7x
topology: tpu7x:2x2x1
jax: 0.10.0
libtpu: 0.0.40
codegen_flags: <defaults>
</compile_context>

<pallas_src>
import numpy as np
import jax
import jax.numpy as jnp
from jax.experimental import pallas as pl
from jax.experimental.pallas import tpu as pltpu


LANE = 128
VMEM_LIMIT_BYTES = 48 * 1024 * 1024   # raise scoped VMEM (defaults: 16 MiB v5e, 32 MiB v6e/v7x)
VMEM_WORK_BUDGET = 36 * 1024 * 1024   # budget used to size tiles (slack kept under the limit)
MAX_BLOCK_B = 1024                    # batch tile: HBM roofline plateaus around 512-1024 rows
MAX_TK = 512                          # K tile when dim_in is large


def _round_up(x, m):
    return (x + m - 1) // m * m


# ----------------------------------------------------------------------------
# Pallas kernel: one (block_b, tn) output tile; K-reduction over grid axis 2.
# ----------------------------------------------------------------------------
def concat_squash_linear_kernel(t_ref, x_ref, wt_ref, vec_ref, out_ref, acc_ref):
    # t_ref   : SMEM (1, 1) f32                 -- scalar time
    # x_ref   : VMEM (block_b, tk)              -- input tile
    # wt_ref  : VMEM (tk, tn)                   -- layer weight tile (pre-transposed)
    # vec_ref : VMEM (4, tn)                    -- [bias, gate_w, gate_b, hyper_b]
    # out_ref : VMEM (block_b, tn)
    # acc_ref : VMEM (block_b, tn) f32 scratch  -- K-reduction accumulator
    k = pl.program_id(2)

    @pl.when(k == 0)
    def _():
        acc_ref[...] = jnp.zeros_like(acc_ref)

    acc_ref[...] += jnp.dot(x_ref[...], wt_ref[...],
                            preferred_element_type=jnp.float32)

    @pl.when(k == pl.num_programs(2) - 1)
    def _():
        t = t_ref[0, 0]
        vec = vec_ref[...]                       # one load of the param slab
        bias = vec[0:1, :]
        gate_w = vec[1:2, :]
        gate_b = vec[2:3, :]
        hyper_b = vec[3:4, :]
        res = acc_ref[...] + bias                # self._layer(x)
        gate = jax.nn.sigmoid(t * gate_w + gate_b)   # EUP slot; free filler
        out_ref[...] = (res * gate + t * hyper_b).astype(out_ref.dtype)


# ----------------------------------------------------------------------------
# Wrapper: padding / packing + tile sizing + pallas_call
# ----------------------------------------------------------------------------
def concat_squash_linear(t, x, params, *, use_bf16=False, block_b=None):
    B, dim_in = x.shape
    dim_out = params["W"].shape[0]

    in_dtype = jnp.bfloat16 if use_bf16 else jnp.float32
    in_bytes = 2 if use_bf16 else 4

    # --- N (dim_out) tiling: pad to a lane-dense multiple of 128; use 256-wide
    #     tiles (v6e/v7x MXU width) when they divide evenly.
    n_pad = _round_up(dim_out, LANE)
    tn = 256 if n_pad % 256 == 0 else LANE
    grid_n = n_pad // tn

    # --- K (dim_in) tiling: keep full K in one block when small, else tile.
    if dim_in <= MAX_TK:
        k_pad, tk = dim_in, dim_in
    else:
        tk = MAX_TK
        k_pad = _round_up(dim_in, tk)
    grid_k = k_pad // tk

    resident_weight = (grid_n == 1 and grid_k == 1)
    wt_bufs = 1 if resident_weight else 2

    # --- Batch tile sized from the VMEM working-set budget.
    if block_b is None:
        fixed = wt_bufs * tk * tn * in_bytes + 2 * 4 * tn * 4          # W^T + slab
        per_row = 2 * tk * in_bytes + 2 * tn * 4 + tn * 4              # x dbuf + out dbuf + acc
        block_b = int(max(8, min(MAX_BLOCK_B, (VMEM_WORK_BUDGET - fixed) // per_row)))
        block_b = (block_b // 256) * 256 if block_b >= 256 else (block_b // 8) * 8
    if block_b >= B:
        if B >= 16:
            # v7x: keep >=2 parallel batch steps so both TensorCores get work.
            block_b = _round_up(pl.cdiv(B, 2), 8)
        else:
            block_b = B
    grid_m = pl.cdiv(B, block_b)

    # --- Pack / pad parameters and inputs.
    wt = params["W"].T.astype(in_dtype)                                 # (dim_in, dim_out)
    if (k_pad, n_pad) != (dim_in, dim_out):
        wt = jnp.zeros((k_pad, n_pad), in_dtype).at[:dim_in, :dim_out].set(wt)
    vec = jnp.stack([params["b"].reshape(-1),
                     params["Wg"].reshape(-1),
                     params["bg"].reshape(-1),
                     params["Wb"].reshape(-1)]).astype(jnp.float32)     # (4, dim_out)
    if n_pad != dim_out:
        vec = jnp.zeros((4, n_pad), jnp.float32).at[:, :dim_out].set(vec)
    x_c = x.astype(in_dtype)
    if k_pad != dim_in:
        x_c = jnp.zeros((B, k_pad), in_dtype).at[:, :dim_in].set(x_c)
    t_arr = jnp.full((1, 1), t, dtype=jnp.float32)

    # --- Build the pallas_call (optionally single-buffering resident params).
    def build(single_buffer):
        param_kwargs = dict(pipeline_mode=pl.Buffered(1)) if single_buffer else {}
        return pl.pallas_call(
            concat_squash_linear_kernel,
            out_shape=jax.ShapeDtypeStruct((B, n_pad), jnp.float32),
            grid=(grid_m, grid_n, grid_k),
            in_specs=[
                pl.BlockSpec(memory_space=pltpu.MemorySpace.SMEM),        # t (whole, SMEM)
                pl.BlockSpec((block_b, tk), lambda i, j, k: (i, k)),      # x tile
                pl.BlockSpec((tk, tn), lambda i, j, k: (k, j),
                             **param_kwargs),                             # W^T tile
                pl.BlockSpec((4, tn), lambda i, j, k: (0, j),
                             **param_kwargs),                             # param slab
            ],
            out_specs=pl.BlockSpec((block_b, tn), lambda i, j, k: (i, j)),
            scratch_shapes=[pltpu.VMEM((block_b, tn), jnp.float32)],      # K accumulator
            compiler_params=pltpu.CompilerParams(
                dimension_semantics=("parallel", "parallel", "arbitrary"),
                vmem_limit_bytes=VMEM_LIMIT_BYTES,
            ),
        )

    try:
        out_p = build(resident_weight)(t_arr, x_c, wt, vec)
    except Exception:
        # Fallback if pl.Buffered(1) is not supported by this jax build.
        if not resident_weight:
            raise
        out_p = build(False)(t_arr, x_c, wt, vec)

    return out_p if n_pad == dim_out else out_p[:, :dim_out]


# ----------------------------------------------------------------------------
# Deterministic parameter construction (mirrors the nn.Module shapes)
# ----------------------------------------------------------------------------
def build_params(key, dim_in, dim_out):
    k1, k2, k3, k4, k5 = jax.random.split(key, 5)
    return {
        "W":  0.2 * jax.random.normal(k1, (dim_out, dim_in), jnp.float32),  # _layer.weight
        "b":  0.2 * jax.random.normal(k2, (dim_out,), jnp.float32),         # _layer.bias
        "Wg": 0.2 * jax.random.normal(k3, (dim_out, 1), jnp.float32),       # _hyper_gate.weight
        "bg": 0.2 * jax.random.normal(k4, (dim_out,), jnp.float32),         # _hyper_gate.bias
        "Wb": 0.2 * jax.random.normal(k5, (dim_out, 1), jnp.float32),       # _hyper_bias.weight
    }


# ----------------------------------------------------------------------------
# Pure-JAX reference (direct transcription of the PyTorch forward)
# ----------------------------------------------------------------------------
def reference_forward(t, x, params):
    res = x @ params["W"].T + params["b"][None, :]
    gate = jax.nn.sigmoid(t * params["Wg"].reshape(1, -1)
                          + params["bg"].reshape(1, -1))
    return res * gate + t * params["Wb"].reshape(1, -1)


# ----------------------------------------------------------------------------
if __name__ == "__main__":
    batch = 8
    dim_in = 16
    dim_out = 32
    t = 0.37

    key = jax.random.PRNGKey(0)
    key, kx, kp = jax.random.split(key, 3)
    x = jax.random.normal(kx, (batch, dim_in), jnp.float32)
    params = build_params(kp, dim_in, dim_out)

    out = concat_squash_linear(t, x, params)
    out = jax.block_until_ready(out)

    ref = jax.block_until_ready(reference_forward(t, x, params))
    assert out.shape == (batch, dim_out)
    np.testing.assert_allclose(np.asarray(out), np.asarray(ref),
                               rtol=1e-4, atol=1e-4)
    print("KERNEL_OK")
</pallas_src>

<mosaic_0001>
module attributes {stable_mosaic.version = 11 : i64} {
  func.func @concat_squash_linear_kernel(%arg0: i32, %arg1: i32, %arg2: i32, %arg3: memref<1x1xf32, #tpu.memory_space<smem>>, %arg4: memref<8x16xf32, #tpu.memory_space<vmem>>, %arg5: memref<16x128xf32, #tpu.memory_space<vmem>>, %arg6: memref<4x128xf32, #tpu.memory_space<vmem>>, %arg7: memref<8x128xf32, #tpu.memory_space<vmem>>, %arg8: memref<8x128xf32, #tpu.memory_space<vmem>>) attributes {dimension_semantics = [#tpu.dimension_semantics<parallel>, #tpu.dimension_semantics<parallel>, #tpu.dimension_semantics<arbitrary>], iteration_bounds = array<i64: 1, 1, 1>, scalar_prefetch = 0 : i64, scratch_operands = 1 : i64, tpu.core_type = #tpu.core_type<tc>, window_params = [{transform_indices = @transform_0, window_bounds = array<i64: 1, 1>}, {transform_indices = @transform_1, window_bounds = array<i64: 8, 16>}, {pipeline_mode = #tpu.pipeline_mode<synchronous>, transform_indices = @transform_2, window_bounds = array<i64: 16, 128>}, {pipeline_mode = #tpu.pipeline_mode<synchronous>, transform_indices = @transform_3, window_bounds = array<i64: 4, 128>}, {transform_indices = @transform_4, window_bounds = array<i64: 8, 128>}]} {
    %c0_i32 = arith.constant 0 : i32
    %0 = arith.cmpi eq, %arg2, %c0_i32 : i32
    %1 = arith.extui %0 : i1 to i32
    %c0_i32_0 = arith.constant 0 : i32
    %2 = arith.cmpi ne, %1, %c0_i32_0 : i32
    scf.if %2 {
      %cst_10 = arith.constant 0.000000e+00 : f32
      %12 = vector.broadcast %cst_10 : f32 to vector<8x128xf32>
      %c0_11 = arith.constant 0 : index
      %c0_12 = arith.constant 0 : index
      %13 = vector.load %arg8[%c0_11, %c0_12] : memref<8x128xf32, #tpu.memory_space<vmem>>, vector<8x128xf32>
      tpu.vector_store %arg8[%c0_11, %c0_12], %12 {strides = array<i32>} : memref<8x128xf32, #tpu.memory_space<vmem>>, vector<8x128xf32>,
    } else {
    }
    %c0 = arith.constant 0 : index
    %c0_1 = arith.constant 0 : index
    %3 = vector.load %arg8[%c0, %c0_1] : memref<8x128xf32, #tpu.memory_space<vmem>>, vector<8x128xf32>
    %c0_2 = arith.constant 0 : index
    %c0_3 = arith.constant 0 : index
    %4 = vector.load %arg4[%c0_2, %c0_3] : memref<8x16xf32, #tpu.memory_space<vmem>>, vector<8x16xf32>
    %c0_4 = arith.constant 0 : index
    %c0_5 = arith.constant 0 : index
    %5 = vector.load %arg5[%c0_4, %c0_5] : memref<16x128xf32, #tpu.memory_space<vmem>>, vector<16x128xf32>
    %cst = arith.constant dense<0.000000e+00> : vector<8x128xf32>
    %6 = tpu.matmul %4, %5, %cst {dimension_numbers = #tpu.dot_dimension_numbers<[1], [0], [0], [1], [0, 0, 1, 1], [], []>} : vector<8x16xf32>, vector<16x128xf32>, vector<8x128xf32> -> vector<8x128xf32>
    %7 = arith.addf %3, %6 : vector<8x128xf32>
    %c0_6 = arith.constant 0 : index
    %c0_7 = arith.constant 0 : index
    %8 = vector.load %arg8[%c0_6, %c0_7] : memref<8x128xf32, #tpu.memory_space<vmem>>, vector<8x128xf32>
    tpu.vector_store %arg8[%c0_6, %c0_7], %7 {strides = array<i32>} : memref<8x128xf32, #tpu.memory_space<vmem>>, vector<8x128xf32>,
    %c0_i32_8 = arith.constant 0 : i32
    %9 = arith.cmpi eq, %arg2, %c0_i32_8 : i32
    %10 = arith.extui %9 : i1 to i32
    %c0_i32_9 = arith.constant 0 : i32
    %11 = arith.cmpi ne, %10, %c0_i32_9 : i32
    scf.if %11 {
      %c0_10 = arith.constant 0 : index
      %c0_11 = arith.constant 0 : index
      %12 = memref.load %arg3[%c0_10, %c0_11] : memref<1x1xf32, #tpu.memory_space<smem>>
      %c0_12 = arith.constant 0 : index
      %c0_13 = arith.constant 0 : index
      %13 = vector.load %arg6[%c0_12, %c0_13] : memref<4x128xf32, #tpu.memory_space<vmem>>, vector<4x128xf32>
      %14 = vector.extract_strided_slice %13 {offsets = [0, 0], sizes = [1, 128], strides = [1, 1]} : vector<4x128xf32> to vector<1x128xf32>
      %15 = vector.extract_strided_slice %13 {offsets = [1, 0], sizes = [1, 128], strides = [1, 1]} : vector<4x128xf32> to vector<1x128xf32>
      %16 = vector.extract_strided_slice %13 {offsets = [2, 0], sizes = [1, 128], strides = [1, 1]} : vector<4x128xf32> to vector<1x128xf32>
      %17 = vector.extract_strided_slice %13 {offsets = [3, 0], sizes = [1, 128], strides = [1, 1]} : vector<4x128xf32> to vector<1x128xf32>
      %c0_14 = arith.constant 0 : index
      %c0_15 = arith.constant 0 : index
      %18 = vector.load %arg8[%c0_14, %c0_15] : memref<8x128xf32, #tpu.memory_space<vmem>>, vector<8x128xf32>
      %19 = vector.broadcast %14 : vector<1x128xf32> to vector<8x128xf32>
      %20 = arith.addf %18, %19 : vector<8x128xf32>
      %21 = vector.broadcast %12 : f32 to vector<1x128xf32>
      %22 = arith.mulf %21, %15 : vector<1x128xf32>
      %23 = arith.addf %22, %16 : vector<1x128xf32>
      %24 = arith.negf %23 : vector<1x128xf32>
      %25 = math.exp %24 : vector<1x128xf32>
      %cst_16 = arith.constant 1.000000e+00 : f32
      %26 = vector.broadcast %cst_16 : f32 to vector<1x128xf32>
      %27 = arith.addf %26, %25 : vector<1x128xf32>
      %28 = arith.divf %26, %27 : vector<1x128xf32>
      %29 = vector.broadcast %28 : vector<1x128xf32> to vector<8x128xf32>
      %30 = arith.mulf %20, %29 : vector<8x128xf32>
      %31 = vector.broadcast %12 : f32 to vector<1x128xf32>
      %32 = arith.mulf %31, %17 : vector<1x128xf32>
      %33 = vector.broadcast %32 : vector<1x128xf32> to vector<8x128xf32>
      %34 = arith.addf %30, %33 : vector<8x128xf32>
      %c0_17 = arith.constant 0 : index
      %c0_18 = arith.constant 0 : index
      %35 = vector.load %arg7[%c0_17, %c0_18] : memref<8x128xf32, #tpu.memory_space<vmem>>, vector<8x128xf32>
      tpu.vector_store %arg7[%c0_17, %c0_18], %34 {strides = array<i32>} : memref<8x128xf32, #tpu.memory_space<vmem>>, vector<8x128xf32>,
    } else {
    }
    return
  }
  func.func @transform_0(%arg0: i32, %arg1: i32, %arg2: i32) -> (i32, i32) {
    %c0_i32 = arith.constant 0 : i32
    %c0_i32_0 = arith.constant 0 : i32
    %c0_i32_1 = arith.constant 0 : i32
    return %c0_i32, %c0_i32_0 : i32, i32
  }
  func.func @transform_1(%arg0: i32, %arg1: i32, %arg2: i32) -> (i32, i32) {
    %c0_i32 = arith.constant 0 : i32
    return %arg0, %arg2 : i32, i32
  }
  func.func @transform_2(%arg0: i32, %arg1: i32, %arg2: i32) -> (i32, i32) {
    %c0_i32 = arith.constant 0 : i32
    return %arg2, %arg1 : i32, i32
  }
  func.func @transform_3(%arg0: i32, %arg1: i32, %arg2: i32) -> (i32, i32) {
    %c0_i32 = arith.constant 0 : i32
    %c0_i32_0 = arith.constant 0 : i32
    return %c0_i32, %arg1 : i32, i32
  }
  func.func @transform_4(%arg0: i32, %arg1: i32, %arg2: i32) -> (i32, i32) {
    %c0_i32 = arith.constant 0 : i32
    return %arg0, %arg1 : i32, i32
  }
}

module attributes {stable_mosaic.version = 11 : i64} {
  func.func @concat_squash_linear_kernel(%arg0: i32, %arg1: i32, %arg2: i32, %arg3: memref<1x1xf32, #tpu.memory_space<smem>>, %arg4: memref<8x16xf32, #tpu.memory_space<vmem>>, %arg5: memref<16x128xf32, #tpu.memory_space<vmem>>, %arg6: memref<4x128xf32, #tpu.memory_space<vmem>>, %arg7: memref<8x128xf32, #tpu.memory_space<vmem>>, %arg8: memref<8x128xf32, #tpu.memory_space<vmem>>) attributes {dimension_semantics = [#tpu.dimension_semantics<parallel>, #tpu.dimension_semantics<parallel>, #tpu.dimension_semantics<arbitrary>], iteration_bounds = array<i64: 1, 1, 1>, scalar_prefetch = 0 : i64, scratch_operands = 1 : i64, tpu.core_type = #tpu.core_type<tc>, window_params = [{transform_indices = @transform_0, window_bounds = array<i64: 1, 1>}, {transform_indices = @transform_1, window_bounds = array<i64: 8, 16>}, {transform_indices = @transform_2, window_bounds = array<i64: 16, 128>}, {transform_indices = @transform_3, window_bounds = array<i64: 4, 128>}, {transform_indices = @transform_4, window_bounds = array<i64: 8, 128>}]} {
    %c0_i32 = arith.constant 0 : i32
    %0 = arith.cmpi eq, %arg2, %c0_i32 : i32
    %1 = arith.extui %0 : i1 to i32
    %c0_i32_0 = arith.constant 0 : i32
    %2 = arith.cmpi ne, %1, %c0_i32_0 : i32
    scf.if %2 {
      %cst_10 = arith.constant 0.000000e+00 : f32
      %12 = vector.broadcast %cst_10 : f32 to vector<8x128xf32>
      %c0_11 = arith.constant 0 : index
      %c0_12 = arith.constant 0 : index
      %13 = vector.load %arg8[%c0_11, %c0_12] : memref<8x128xf32, #tpu.memory_space<vmem>>, vector<8x128xf32>
      tpu.vector_store %arg8[%c0_11, %c0_12], %12 {strides = array<i32>} : memref<8x128xf32, #tpu.memory_space<vmem>>, vector<8x128xf32>,
    } else {
    }
    %c0 = arith.constant 0 : index
    %c0_1 = arith.constant 0 : index
    %3 = vector.load %arg8[%c0, %c0_1] : memref<8x128xf32, #tpu.memory_space<vmem>>, vector<8x128xf32>
    %c0_2 = arith.constant 0 : index
    %c0_3 = arith.constant 0 : index
    %4 = vector.load %arg4[%c0_2, %c0_3] : memref<8x16xf32, #tpu.memory_space<vmem>>, vector<8x16xf32>
    %c0_4 = arith.constant 0 : index
    %c0_5 = arith.constant 0 : index
    %5 = vector.load %arg5[%c0_4, %c0_5] : memref<16x128xf32, #tpu.memory_space<vmem>>, vector<16x128xf32>
    %cst = arith.constant dense<0.000000e+00> : vector<8x128xf32>
    %6 = tpu.matmul %4, %5, %cst {dimension_numbers = #tpu.dot_dimension_numbers<[1], [0], [0], [1], [0, 0, 1, 1], [], []>} : vector<8x16xf32>, vector<16x128xf32>, vector<8x128xf32> -> vector<8x128xf32>
    %7 = arith.addf %3, %6 : vector<8x128xf32>
    %c0_6 = arith.constant 0 : index
    %c0_7 = arith.constant 0 : index
    %8 = vector.load %arg8[%c0_6, %c0_7] : memref<8x128xf32, #tpu.memory_space<vmem>>, vector<8x128xf32>
    tpu.vector_store %arg8[%c0_6, %c0_7], %7 {strides = array<i32>} : memref<8x128xf32, #tpu.memory_space<vmem>>, vector<8x128xf32>,
    %c0_i32_8 = arith.constant 0 : i32
    %9 = arith.cmpi eq, %arg2, %c0_i32_8 : i32
    %10 = arith.extui %9 : i1 to i32
    %c0_i32_9 = arith.constant 0 : i32
    %11 = arith.cmpi ne, %10, %c0_i32_9 : i32
    scf.if %11 {
      %c0_10 = arith.constant 0 : index
      %c0_11 = arith.constant 0 : index
      %12 = memref.load %arg3[%c0_10, %c0_11] : memref<1x1xf32, #tpu.memory_space<smem>>
      %c0_12 = arith.constant 0 : index
      %c0_13 = arith.constant 0 : index
      %13 = vector.load %arg6[%c0_12, %c0_13] : memref<4x128xf32, #tpu.memory_space<vmem>>, vector<4x128xf32>
      %14 = vector.extract_strided_slice %13 {offsets = [0, 0], sizes = [1, 128], strides = [1, 1]} : vector<4x128xf32> to vector<1x128xf32>
      %15 = vector.extract_strided_slice %13 {offsets = [1, 0], sizes = [1, 128], strides = [1, 1]} : vector<4x128xf32> to vector<1x128xf32>
      %16 = vector.extract_strided_slice %13 {offsets = [2, 0], sizes = [1, 128], strides = [1, 1]} : vector<4x128xf32> to vector<1x128xf32>
      %17 = vector.extract_strided_slice %13 {offsets = [3, 0], sizes = [1, 128], strides = [1, 1]} : vector<4x128xf32> to vector<1x128xf32>
      %c0_14 = arith.constant 0 : index
      %c0_15 = arith.constant 0 : index
      %18 = vector.load %arg8[%c0_14, %c0_15] : memref<8x128xf32, #tpu.memory_space<vmem>>, vector<8x128xf32>
      %19 = vector.broadcast %14 : vector<1x128xf32> to vector<8x128xf32>
      %20 = arith.addf %18, %19 : vector<8x128xf32>
      %21 = vector.broadcast %12 : f32 to vector<1x128xf32>
      %22 = arith.mulf %21, %15 : vector<1x128xf32>
      %23 = arith.addf %22, %16 : vector<1x128xf32>
      %24 = arith.negf %23 : vector<1x128xf32>
      %25 = math.exp %24 : vector<1x128xf32>
      %cst_16 = arith.constant 1.000000e+00 : f32
      %26 = vector.broadcast %cst_16 : f32 to vector<1x128xf32>
      %27 = arith.addf %26, %25 : vector<1x128xf32>
      %28 = arith.divf %26, %27 : vector<1x128xf32>
      %29 = vector.broadcast %28 : vector<1x128xf32> to vector<8x128xf32>
      %30 = arith.mulf %20, %29 : vector<8x128xf32>
      %31 = vector.broadcast %12 : f32 to vector<1x128xf32>
      %32 = arith.mulf %31, %17 : vector<1x128xf32>
      %33 = vector.broadcast %32 : vector<1x128xf32> to vector<8x128xf32>
      %34 = arith.addf %30, %33 : vector<8x128xf32>
      %c0_17 = arith.constant 0 : index
      %c0_18 = arith.constant 0 : index
      %35 = vector.load %arg7[%c0_17, %c0_18] : memref<8x128xf32, #tpu.memory_space<vmem>>, vector<8x128xf32>
      tpu.vector_store %arg7[%c0_17, %c0_18], %34 {strides = array<i32>} : memref<8x128xf32, #tpu.memory_space<vmem>>, vector<8x128xf32>,
    } else {
    }
    return
  }
  func.func @transform_0(%arg0: i32, %arg1: i32, %arg2: i32) -> (i32, i32) {
    %c0_i32 = arith.constant 0 : i32
    %c0_i32_0 = arith.constant 0 : i32
    %c0_i32_1 = arith.constant 0 : i32
    return %c0_i32, %c0_i32_0 : i32, i32
  }
  func.func @transform_1(%arg0: i32, %arg1: i32, %arg2: i32) -> (i32, i32) {
    %c0_i32 = arith.constant 0 : i32
    return %arg0, %arg2 : i32, i32
  }
  func.func @transform_2(%arg0: i32, %arg1: i32, %arg2: i32) -> (i32, i32) {
    %c0_i32 = arith.constant 0 : i32
    return %arg2, %arg1 : i32, i32
  }
  func.func @transform_3(%arg0: i32, %arg1: i32, %arg2: i32) -> (i32, i32) {
    %c0_i32 = arith.constant 0 : i32
    %c0_i32_0 = arith.constant 0 : i32
    return %c0_i32, %arg1 : i32, i32
  }
  func.func @transform_4(%arg0: i32, %arg1: i32, %arg2: i32) -> (i32, i32) {
    %c0_i32 = arith.constant 0 : i32
    return %arg0, %arg1 : i32, i32
  }
}

</mosaic_0001>

<bundles_post_ra>
// kernel: tpu_custom_call.1
= control target key start
LH: loop header
LB: loop body
LE: loop exit
PB: predicated region body
PF: predicated region fallthrough
CT: control target
= control target key end

     0   :  { %10 = vsyncpa [#allocation5], 0  ;;  %s361_s0 = inlined_call_operand.<no memory space> [shape: f32[1,1], index: 0, kind: input, shape index: {}]   ;;  %s362_s1 = inlined_call_operand.hbm [shape: f32[8,16], index: 1, kind: input, shape index: {}]   ;;  %s363_s2 = inlined_call_operand.hbm [shape: f32[16,128], index: 2, kind: input, shape index: {}]   ;;  %s364_s3 = inlined_call_operand.vmem [shape: f32[4,128], index: 3, kind: input, shape index: {}]   ;;  %s365_s4 = inlined_call_operand.hbm [shape: f32[8,128], index: 4, kind: output, shape index: {}]  }
   0x1   :  { %11 = vsyncpa [#allocation8], 0 }
   0x2   :  { %12 = vsyncpa [#allocation6], 0  ;;  %s279_s15 = smov [#allocation4]   ;;  %s280_s17 = smov [#allocation7]  }
   0x3   :  { %s21_s16 = sshll.u32 %s279_s15, 4  ;;  %s30_s18 = sshll.u32 %s280_s17, 4  ;;  %s22_s16 = int_to_ptr.vmem [resolvable:$true] %s21_s16  ;;  %s312_s18 = int_to_ptr.vmem [resolvable:$true] %s30_s18 }
   0x4   :  { %s207_s21 = scalar_lea.hbm %s362_s1, 128 }
   0x5   :  { %p208_p0 = scmp.ne.s32.totalorder %s362_s1, %s207_s21  ;;  %p211_p1 = scmp.lt.u32.totalorder %s207_s21, %s362_s1 }
   0x7   :  { %p213_p2 = pnand %p211_p1, %p208_p0 }
   0x9   :  { %216 = shalt.err (!%p213_p2)
}
   0xa   :  { %s217_s26 = scalar_lea.vmem %s22_s16, 128  ;;  %p222_p4 = scmp.lt.s32.totalorder %s22_s16, %s22_s16 }
   0xb   :  { %p218_p3 = scmp.ne.s32.totalorder %s22_s16, %s217_s26  ;;  %p223_p5 = scmp.lt.s32.totalorder %s217_s26, %s217_s26 }
   0xd   :  { %p224_p6 = por %p223_p5, %p222_p4 }
   0xf   :  { %p225_p7 = pnand %p224_p6, %p218_p3 }
  0x11   :  { %228 = shalt.err (!%p225_p7)
}
  0x12   :  { %24 = dma.hbm_to_vmem [thread:$0]  %s362_s1, 128, %s22_s16, [#allocation5]  }
  0x13   :  { %s229_s5 = scalar_lea.hbm %s363_s2, 256 }
  0x14   :  { %p230_p8 = scmp.ne.s32.totalorder %s363_s2, %s229_s5  ;;  %p233_p9 = scmp.lt.u32.totalorder %s229_s5, %s363_s2 }
  0x16   :  { %p235_p10 = pnand %p233_p9, %p230_p8 }
  0x18   :  { %238 = shalt.err (!%p235_p10)
}
  0x19   :  { %s239_s10 = scalar_lea.vmem %s312_s18, 256  ;;  %p244_p12 = scmp.lt.s32.totalorder %s312_s18, %s312_s18 }
  0x1a   :  { %p240_p11 = scmp.ne.s32.totalorder %s312_s18, %s239_s10  ;;  %p245_p13 = scmp.lt.s32.totalorder %s239_s10, %s239_s10 }
  0x1c   :  { %p246_p0 = por %p245_p13, %p244_p12 }
  0x1e   :  { %p247_p1 = pnand %p246_p0, %p240_p11 }
  0x20   :  { %250 = shalt.err (!%p247_p1)
}
  0x21   :  { %s281_s1 = smov 128   ;;  %s282_s11 = smov 8  }
  0x22   :  { %36 = dma.hbm_to_vmem [thread:$0]  %s363_s2, 256, %s312_s18, [#allocation8], %s281_s1, %s281_s1, %s282_s11  }
  0x23   :  { %273 = dma.done.wait [#allocation5], 128  }
  0x24   :  { %274 = vsyncadd [#allocation5], 4294967168 }
  0x25   :  { %275 = dma.done.wait [#allocation8], 256  }
  0x26   :  { %276 = vsyncadd [#allocation8], 4294967040  ;;  %v283_v0 = vmov 0.0|0.0   ;;  %vm284_vm0 = vmmov 0   ;;  %v285_v1 = vmov 0.0   ;;  %v52_v2 = vld [vmem:[#allocation7] sm:$0xff]  ;;  %v141_v7 = vstv %s361_s0 }
  0x27   :  { %192 = vmatprep.subr.bf16.mxu0 %v283_v0  ;;  %189 = vmatprep.mubr.msk.f32.mxu0 %vm284_vm0, %v285_v1  ;;  %v53_v3 = vld [vmem:[#allocation7 + $0x8] sm:$0xff]  ;;  %v51_v5 = vld [vmem:[#allocation4] sm:$0xff]  ;;  %vm54_vm1 = vcmask 130048   ;;  %v136_v14 = vlaneseq  ;;  %s286_s0 = smov [#allocation9]  }
  0x28   :  { %v193_v4 = vpack.c.bf16 %v53_v3, %v52_v2  ;;  %v134_v6 = vld [vmem:[%s364_s3] sm:$0xf]  ;;  %s170_s3 = sshll.u32 %s286_s0, 4  ;;  %s171_s3 = int_to_ptr.vmem [resolvable:$true] %s170_s3 }
  0x29   :  { %v142_v8 = vmul.f32 %v141_v7, %v134_v6  ;;  %v144_v9 = vrot.slane %v134_v6, 1  ;;  %v137_v15 = vshrl.u32 %v136_v14, 7  ;;  %s251_s17 = scalar_lea.vmem %s171_s3, 128  ;;  %p256_p3 = scmp.lt.s32.totalorder %s171_s3, %s171_s3 }
  0x2a   :  { %194 = vmatpush3.bf16.msra.mxu0 %v193_v4  ;;  %p252_p2 = scmp.ne.s32.totalorder %s171_s3, %s251_s17  ;;  %p257_p4 = scmp.lt.s32.totalorder %s251_s17, %s251_s17 }
  0x2b   :  { %v146_v10 = vadd.f32 %v144_v9, %v142_v8  ;;  %v138_v16 = vsub.s32 0, %v137_v15  ;;  %v155_v17 = vsub.s32 1, %v137_v15  ;;  %v160_v20 = vsub.s32 3, %v137_v15 }
  0x2c   :  { %p258_p5 = por %p257_p4, %p256_p3 }
  0x2d   :  { %190 = vmatmul.mubr.msk.f32.vlgmr.msra.gmra.mrb[0].mxu0 %vm54_vm1, %v51_v5  ;;  %v181_v11 = vmul.f32 -1.442695, %v146_v10  ;;  %v139_v19 = vrot.slane %v134_v6, %v138_v16  ;;  %v161_v25 = vrot.slane %v142_v8, %v160_v20 }
  0x2e   :  { %p259_p6 = pnand %p258_p5, %p252_p2 }
  0x2f   :  { %203 = vpow2.f32 %v181_v11 }
  0x39   :  { %v204_v12 = vpop.eup %203 }
  0x3a   :  { %v150_v13 = vadd.f32 1.0, %v204_v12 }
  0x3c   :  { %205 = vrcp.f32 %v150_v13 }
  0x46   :  { %v206_v18 = vpop.eup %205 }
  0x47   :  { %v156_v21 = vrot.slane %v206_v18, %v155_v17 }
 0x100   :  { %v124_v22 = vpop.f32.mrb[0].mxu0 }
 0x101   :  { %v140_v23 = vadd.f32 %v139_v19, %v124_v22  ;;  %v191_v24 = vpop.f32.mrb[1].mxu0 }
 0x103   :  { %v157_v26 = vmul.f32 %v156_v21, %v140_v23 }
 0x105   :  { %v162_v27 = vadd.f32 %v161_v25, %v157_v26 }
 0x107   :  { %163 = vst [vmem:[#allocation9] sm:$0xff] %v162_v27 }
 0x108   :  { %262 = shalt.err (!%p259_p6)
}
 0x109   :  { %s263_s20 = scalar_lea.hbm %s365_s4, 128 }
 0x10a   :  { %p264_p7 = scmp.ne.s32.totalorder %s365_s4, %s263_s20  ;;  %p267_p8 = scmp.lt.u32.totalorder %s263_s20, %s365_s4 }
 0x10c   :  { %p269_p9 = pnand %p267_p8, %p264_p7 }
 0x10e   :  { %272 = shalt.err (!%p269_p9)
}
 0x10f   :  { %173 = dma.vmem_to_hbm [thread:$0]  %s171_s3, 128, %s365_s4, [#allocation6]  }
 0x110   :  { %277 = dma.done.wait [#allocation6], 128  }
 0x111   :  { %278 = vsyncadd [#allocation6], 4294967168 }
 0x112   :  { %177 = vsyncpa [#allocation5], 1 }
 0x113   :  { %178 = vsyncpa [#allocation8], 1 }
 0x114   :  { %179 = vsyncpa [#allocation6], 1 }

// kernel: tpu_custom_call.1
= control target key start
LH: loop header
LB: loop body
LE: loop exit
PB: predicated region body
PF: predicated region fallthrough
CT: control target
= control target key end

     0   :  { %10 = vsyncpa [#allocation5], 0  ;;  %s361_s0 = inlined_call_operand.<no memory space> [shape: f32[1,1], index: 0, kind: input, shape index: {}]   ;;  %s362_s1 = inlined_call_operand.hbm [shape: f32[8,16], index: 1, kind: input, shape index: {}]   ;;  %s363_s2 = inlined_call_operand.hbm [shape: f32[16,128], index: 2, kind: input, shape index: {}]   ;;  %s364_s3 = inlined_call_operand.vmem [shape: f32[4,128], index: 3, kind: input, shape index: {}]   ;;  %s365_s4 = inlined_call_operand.hbm [shape: f32[8,128], index: 4, kind: output, shape index: {}]  }
   0x1   :  { %11 = vsyncpa [#allocation8], 0 }
   0x2   :  { %12 = vsyncpa [#allocation6], 0  ;;  %s279_s15 = smov [#allocation4]   ;;  %s280_s17 = smov [#allocation7]  }
   0x3   :  { %s21_s16 = sshll.u32 %s279_s15, 4  ;;  %s30_s18 = sshll.u32 %s280_s17, 4  ;;  %s22_s16 = int_to_ptr.vmem [resolvable:$true] %s21_s16  ;;  %s312_s18 = int_to_ptr.vmem [resolvable:$true] %s30_s18 }
   0x4   :  { %s207_s21 = scalar_lea.hbm %s362_s1, 128 }
   0x5   :  { %p208_p0 = scmp.ne.s32.totalorder %s362_s1, %s207_s21  ;;  %p211_p1 = scmp.lt.u32.totalorder %s207_s21, %s362_s1 }
   0x7   :  { %p213_p2 = pnand %p211_p1, %p208_p0 }
   0x9   :  { %216 = shalt.err (!%p213_p2)
}
   0xa   :  { %s217_s26 = scalar_lea.vmem %s22_s16, 128  ;;  %p222_p4 = scmp.lt.s32.totalorder %s22_s16, %s22_s16 }
   0xb   :  { %p218_p3 = scmp.ne.s32.totalorder %s22_s16, %s217_s26  ;;  %p223_p5 = scmp.lt.s32.totalorder %s217_s26, %s217_s26 }
   0xd   :  { %p224_p6 = por %p223_p5, %p222_p4 }
   0xf   :  { %p225_p7 = pnand %p224_p6, %p218_p3 }
  0x11   :  { %228 = shalt.err (!%p225_p7)
}
  0x12   :  { %24 = dma.hbm_to_vmem [thread:$0]  %s362_s1, 128, %s22_s16, [#allocation5]  }
  0x13   :  { %s229_s5 = scalar_lea.hbm %s363_s2, 256 }
  0x14   :  { %p230_p8 = scmp.ne.s32.totalorder %s363_s2, %s229_s5  ;;  %p233_p9 = scmp.lt.u32.totalorder %s229_s5, %s363_s2 }
  0x16   :  { %p235_p10 = pnand %p233_p9, %p230_p8 }
  0x18   :  { %238 = shalt.err (!%p235_p10)
}
  0x19   :  { %s239_s10 = scalar_lea.vmem %s312_s18, 256  ;;  %p244_p12 = scmp.lt.s32.totalorder %s312_s18, %s312_s18 }
  0x1a   :  { %p240_p11 = scmp.ne.s32.totalorder %s312_s18, %s239_s10  ;;  %p245_p13 = scmp.lt.s32.totalorder %s239_s10, %s239_s10 }
  0x1c   :  { %p246_p0 = por %p245_p13, %p244_p12 }
  0x1e   :  { %p247_p1 = pnand %p246_p0, %p240_p11 }
  0x20   :  { %250 = shalt.err (!%p247_p1)
}
  0x21   :  { %s281_s1 = smov 128   ;;  %s282_s11 = smov 8  }
  0x22   :  { %36 = dma.hbm_to_vmem [thread:$0]  %s363_s2, 256, %s312_s18, [#allocation8], %s281_s1, %s281_s1, %s282_s11  }
  0x23   :  { %273 = dma.done.wait [#allocation5], 128  }
  0x24   :  { %274 = vsyncadd [#allocation5], 4294967168 }
  0x25   :  { %275 = dma.done.wait [#allocation8], 256  }
  0x26   :  { %276 = vsyncadd [#allocation8], 4294967040  ;;  %v283_v0 = vmov 0.0|0.0   ;;  %vm284_vm0 = vmmov 0   ;;  %v285_v1 = vmov 0.0   ;;  %v52_v2 = vld [vmem:[#allocation7] sm:$0xff]  ;;  %v141_v7 = vstv %s361_s0 }
  0x27   :  { %192 = vmatprep.subr.bf16.mxu0 %v283_v0  ;;  %189 = vmatprep.mubr.msk.f32.mxu0 %vm284_vm0, %v285_v1  ;;  %v53_v3 = vld [vmem:[#allocation7 + $0x8] sm:$0xff]  ;;  %v51_v5 = vld [vmem:[#allocation4] sm:$0xff]  ;;  %vm54_vm1 = vcmask 130048   ;;  %v136_v14 = vlaneseq  ;;  %s286_s0 = smov [#allocation9]  }
  0x28   :  { %v193_v4 = vpack.c.bf16 %v53_v3, %v52_v2  ;;  %v134_v6 = vld [vmem:[%s364_s3] sm:$0xf]  ;;  %s170_s3 = sshll.u32 %s286_s0, 4  ;;  %s171_s3 = int_to_ptr.vmem [resolvable:$true] %s170_s3 }
  0x29   :  { %v142_v8 = vmul.f32 %v141_v7, %v134_v6  ;;  %v144_v9 = vrot.slane %v134_v6, 1  ;;  %v137_v15 = vshrl.u32 %v136_v14, 7  ;;  %s251_s17 = scalar_lea.vmem %s171_s3, 128  ;;  %p256_p3 = scmp.lt.s32.totalorder %s171_s3, %s171_s3 }
  0x2a   :  { %194 = vmatpush3.bf16.msra.mxu0 %v193_v4  ;;  %p252_p2 = scmp.ne.s32.totalorder %s171_s3, %s251_s17  ;;  %p257_p4 = scmp.lt.s32.totalorder %s251_s17, %s251_s17 }
  0x2b   :  { %v146_v10 = vadd.f32 %v144_v9, %v142_v8  ;;  %v138_v16 = vsub.s32 0, %v137_v15  ;;  %v155_v17 = vsub.s32 1, %v137_v15  ;;  %v160_v20 = vsub.s32 3, %v137_v15 }
  0x2c   :  { %p258_p5 = por %p257_p4, %p256_p3 }
  0x2d   :  { %190 = vmatmul.mubr.msk.f32.vlgmr.msra.gmra.mrb[0].mxu0 %vm54_vm1, %v51_v5  ;;  %v181_v11 = vmul.f32 -1.442695, %v146_v10  ;;  %v139_v19 = vrot.slane %v134_v6, %v138_v16  ;;  %v161_v25 = vrot.slane %v142_v8, %v160_v20 }
  0x2e   :  { %p259_p6 = pnand %p258_p5, %p252_p2 }
  0x2f   :  { %203 = vpow2.f32 %v181_v11 }
  0x39   :  { %v204_v12 = vpop.eup %203 }
  0x3a   :  { %v150_v13 = vadd.f32 1.0, %v204_v12 }
  0x3c   :  { %205 = vrcp.f32 %v150_v13 }
  0x46   :  { %v206_v18 = vpop.eup %205 }
  0x47   :  { %v156_v21 = vrot.slane %v206_v18, %v155_v17 }
 0x100   :  { %v124_v22 = vpop.f32.mrb[0].mxu0 }
 0x101   :  { %v140_v23 = vadd.f32 %v139_v19, %v124_v22  ;;  %v191_v24 = vpop.f32.mrb[1].mxu0 }
 0x103   :  { %v157_v26 = vmul.f32 %v156_v21, %v140_v23 }
 0x105   :  { %v162_v27 = vadd.f32 %v161_v25, %v157_v26 }
 0x107   :  { %163 = vst [vmem:[#allocation9] sm:$0xff] %v162_v27 }
 0x108   :  { %262 = shalt.err (!%p259_p6)
}
 0x109   :  { %s263_s20 = scalar_lea.hbm %s365_s4, 128 }
 0x10a   :  { %p264_p7 = scmp.ne.s32.totalorder %s365_s4, %s263_s20  ;;  %p267_p8 = scmp.lt.u32.totalorder %s263_s20, %s365_s4 }
 0x10c   :  { %p269_p9 = pnand %p267_p8, %p264_p7 }
 0x10e   :  { %272 = shalt.err (!%p269_p9)
}
 0x10f   :  { %173 = dma.vmem_to_hbm [thread:$0]  %s171_s3, 128, %s365_s4, [#allocation6]  }
 0x110   :  { %277 = dma.done.wait [#allocation6], 128  }
 0x111   :  { %278 = vsyncadd [#allocation6], 4294967168 }
 0x112   :  { %177 = vsyncpa [#allocation5], 1 }
 0x113   :  { %178 = vsyncpa [#allocation8], 1 }
 0x114   :  { %179 = vsyncpa [#allocation6], 1 }

</bundles_post_ra>
